<compile_context>
chip_gen: v7x
topology: tpu7x:2x2x1
jax: 0.10.0
libtpu: 0.0.40
codegen_flags: <defaults>
</compile_context>

<pallas_src>
import functools
import typing as tp

import numpy as np
import jax
import jax.numpy as jnp
from jax.experimental import pallas as pl
from jax.experimental.pallas import tpu as pltpu


# ----------------------------- band-index helpers (pure python/numpy glue) ---

def get_fftfreq(sr: int = 44100, n_fft: int = 2048) -> np.ndarray:
    out = sr * np.fft.fftfreq(n_fft)[: n_fft // 2 + 1]
    out = out.copy()
    out[-1] = sr // 2
    return out


def get_subband_indices(
    freqs: np.ndarray, splits: tp.List[tp.Tuple[int, int]]
) -> tp.List[tp.Tuple[int, int]]:
    indices = []
    start_freq, start_index = 0, 0
    for end_freq, step in splits:
        bands = np.arange(start_freq + step, end_freq + step, step)
        start_freq = end_freq
        for band in bands:
            end_index = int((freqs < band).sum())
            indices.append((start_index, end_index))
            start_index = end_index
    indices.append((start_index, int(freqs.shape[0])))
    return indices


def freq2bands(
    bandsplits: tp.List[tp.Tuple[int, int]], sr: int = 44100, n_fft: int = 2048
) -> tp.List[tp.Tuple[int, int]]:
    return get_subband_indices(get_fftfreq(sr=sr, n_fft=n_fft), bandsplits)


def _round_up(v: int, m: int) -> int:
    return ((v + m - 1) // m) * m


# ----------------------------------------------------------- Pallas kernel ---

def _bandsplit_fc_kernel(starts_ref, x_hbm, w_ref, b_ref, o_ref, xbuf, sem,
                         *, tbt, in_win):
    # starts_ref: SMEM int32 [K]   128-aligned per-band column offsets (prefetched)
    # x_hbm    : HBM [bt_pad, F_pad] bf16   time-major feature slab (ANY space)
    # w_ref    : VMEM (1, IN_WIN, D) bf16   zero-padded band weight (k-resident)
    # b_ref    : VMEM (1, 1, D) f32
    # o_ref    : VMEM (1, tbt, D) bf16
    # xbuf     : VMEM (tbt, IN_WIN) bf16    manual-DMA landing buffer
    k = pl.program_id(0)
    t = pl.program_id(1)
    col0 = pl.multiple_of(starts_ref[k], 128)   # aligned band-window start
    row0 = pl.multiple_of(t * tbt, 8)           # BT tile start
    cp = pltpu.make_async_copy(
        x_hbm.at[pl.ds(row0, tbt), pl.ds(col0, in_win)], xbuf, sem.at[0])
    cp.start()
    cp.wait()
    # TODO(synk): double-buffer this input DMA across grid steps; compute is
    # tiny and the auto-pipelined bf16 output already keeps HBM mostly busy.
    y = jnp.dot(xbuf[...], w_ref[0], preferred_element_type=jnp.float32)
    o_ref[0] = (y + b_ref[0]).astype(o_ref.dtype)


def _run_bandsplit_fc(x_slab, w, b, starts, tbt):
    """x_slab: [bt_pad, F_pad] bf16, w: [K, IN_WIN, D] bf16, b: [K, 1, D] f32,
    starts: [K] int32 (128-aligned column offsets). Returns [K, bt_pad, D] bf16."""
    bt_pad, _ = x_slab.shape
    K, in_win, D = w.shape
    n_bt = bt_pad // tbt

    flops = 2 * K * bt_pad * in_win * D
    bytes_accessed = (K * bt_pad * in_win * 2        # gathered input windows
                      + w.size * 2 + b.size * 4      # params
                      + K * bt_pad * D * 2)          # bf16 output
    kernel = functools.partial(_bandsplit_fc_kernel, tbt=tbt, in_win=in_win)

    return pl.pallas_call(
        kernel,
        out_shape=jax.ShapeDtypeStruct((K, bt_pad, D), jnp.bfloat16),
        grid_spec=pltpu.PrefetchScalarGridSpec(
            num_scalar_prefetch=1,
            grid=(K, n_bt),
            in_specs=[
                # full slab stays in HBM; the band window is DMA'd manually
                pl.BlockSpec(memory_space=pl.ANY),
                # weight/bias depend only on k -> resident across the BT loop
                pl.BlockSpec((1, in_win, D), lambda k, t, s: (k, 0, 0)),
                pl.BlockSpec((1, 1, D), lambda k, t, s: (k, 0, 0)),
            ],
            out_specs=pl.BlockSpec((1, tbt, D), lambda k, t, s: (k, t, 0)),
            scratch_shapes=[
                pltpu.VMEM((tbt, in_win), jnp.bfloat16),
                pltpu.SemaphoreType.DMA((1,)),
            ],
        ),
        compiler_params=pltpu.CompilerParams(
            dimension_semantics=("parallel", "parallel"),
        ),
        cost_estimate=pl.CostEstimate(
            flops=flops, transcendentals=0, bytes_accessed=bytes_accessed),
    )(starts, x_slab, w, b)


# ------------------------------------------------------------ module class ---

class BandSplitModulePallas:
    """JAX/Pallas port of BandSplitModule (is_layernorm=False path)."""

    _TARGET_TBT = 2048   # B*T rows per tile (multiple of 16); safe on v5e/v6e/v7x
    _ALIGN = 128         # band DMA windows start on 128-lane boundaries

    def __init__(
        self,
        sr: int,
        n_fft: int,
        bandsplits: tp.List[tp.Tuple[int, int]],
        t_timesteps: int = 517,
        fc_dim: int = 128,
        complex_as_channel: bool = True,
        is_mono: bool = False,
        is_layernorm: bool = False,
        key: jax.Array = None,
    ):
        if is_layernorm:
            # TODO(synk): per-band nn.LayerNorm([(e-s)*mul, T]) path not implemented.
            raise NotImplementedError("is_layernorm=True is not supported")

        frequency_mul = 1
        if complex_as_channel:
            frequency_mul *= 2
        if not is_mono:
            frequency_mul *= 2
        self.cac = complex_as_channel
        self.is_mono = is_mono
        self.n_ch = 1 if is_mono else 2
        self.n_reim = 2 if complex_as_channel else 1
        self.frequency_mul = frequency_mul
        self.fc_dim = fc_dim
        self.t_timesteps = t_timesteps   # only used by the (unsupported) layernorm path
        self.bandwidth_indices = freq2bands(bandsplits, sr, n_fft)
        self.is_layernorm = is_layernorm
        self.n_freq = n_fft // 2 + 1

        if key is None:
            key = jax.random.PRNGKey(0)

        D = fc_dim
        K = len(self.bandwidth_indices)
        mul = frequency_mul
        self.in_dims = [(e - s) * mul for s, e in self.bandwidth_indices]

        # Deterministic per-band Linear params in torch layout: W_i [D, in_i], b_i [D].
        self.w_torch: tp.List[jax.Array] = []
        self.b_torch: tp.List[jax.Array] = []
        for in_i in self.in_dims:
            key, kw, kb = jax.random.split(key, 3)
            bound = 1.0 / np.sqrt(in_i)
            self.w_torch.append(jax.random.uniform(
                kw, (D, in_i), minval=-bound, maxval=bound, dtype=jnp.float32))
            self.b_torch.append(jax.random.uniform(
                kb, (D,), minval=-bound, maxval=bound, dtype=jnp.float32))

        # ---- kernel-side packed params --------------------------------------
        # The kernel DMAs a fixed-width window of the (freq, ch, re/im)-ordered
        # feature slab starting at a 128-aligned column; the true weight rows
        # are placed at the misalignment offset inside a zero-padded
        # [IN_WIN, D] block, so out-of-band / padded features hit zero rows.
        starts_raw = np.array([s * mul for s, _ in self.bandwidth_indices], np.int64)
        aligned = (starts_raw // self._ALIGN) * self._ALIGN
        shifts = starts_raw - aligned
        in_arr = np.array(self.in_dims, np.int64)
        self.in_win = int(_round_up(int(np.max(shifts + in_arr)), self._ALIGN))
        self.f_pad = int(_round_up(
            max(self.n_freq * mul, int(np.max(aligned)) + self.in_win), self._ALIGN))

        wk = np.zeros((K, self.in_win, D), np.float32)
        for i, ((s, e), in_i) in enumerate(zip(self.bandwidth_indices, self.in_dims)):
            w_bins = e - s
            perm = self._perm_torch_to_fcr(w_bins)           # (c,r,f) -> (f,c,r)
            w_perm = np.asarray(self.w_torch[i])[:, perm]     # [D, in_i]
            wk[i, int(shifts[i]):int(shifts[i]) + in_i, :] = w_perm.T
        self.w_kernel = jnp.asarray(wk, dtype=jnp.bfloat16)            # [K, IN_WIN, D]
        self.b_kernel = jnp.stack(
            [b[None, :] for b in self.b_torch], axis=0)                # [K, 1, D] f32
        self.starts_kernel = jnp.asarray(aligned, dtype=jnp.int32)     # [K]

    def _perm_torch_to_fcr(self, w_bins: int) -> np.ndarray:
        """Map slab feature order (f, c, re/im) -> torch Linear input order (c, re/im, f)."""
        C, R = self.n_ch, self.n_reim
        new = np.arange(w_bins * C * R)
        f = new // (C * R)
        c = (new % (C * R)) // R
        r = new % R
        return c * (R * w_bins) + r * w_bins + f   # old (torch) index per new position

    # ---- layout glue: one bf16 transpose of the whole tensor -----------------

    def _make_slab(self, x: jax.Array) -> jax.Array:
        """[B, C, F, T] (complex or real) -> bf16 slab [B*T, F*mul] with features
        ordered (freq, channel, re/im); every band is a contiguous column range."""
        B, C, F, T = x.shape
        if jnp.iscomplexobj(x):
            xr = jnp.stack([jnp.real(x), jnp.imag(x)], axis=-1).astype(jnp.bfloat16)
            xr = jnp.transpose(xr, (0, 3, 2, 1, 4))          # [B, T, F, C, 2]
        else:
            xr = jnp.transpose(x.astype(jnp.bfloat16), (0, 3, 2, 1))   # [B, T, F, C]
        return xr.reshape(B * T, F * self.frequency_mul)

    # ---- forward --------------------------------------------------------------

    def __call__(self, x: jax.Array) -> jax.Array:
        """
        Input : [B, C, F, T] (complex64 when complex_as_channel)
        Output: [B, fc_dim, T, K]  (== torch.stack(xs, 3).permute(0, 2, 1, 3))
        """
        B, C, F, T = x.shape
        assert C == self.n_ch, (C, self.n_ch)
        assert F == self.n_freq, (F, self.n_freq)
        assert bool(jnp.iscomplexobj(x)) == self.cac
        K = len(self.bandwidth_indices)
        D = self.fc_dim
        BT = B * T

        slab = self._make_slab(x)                                  # [BT, F*mul] bf16

        # BT row tiling: ~_TARGET_TBT rows/tile, multiple of 16, minimal padding.
        bt16 = _round_up(BT, 16)
        n_bt = max(1, (bt16 + self._TARGET_TBT - 1) // self._TARGET_TBT)
        tbt = _round_up((bt16 + n_bt - 1) // n_bt, 16)
        bt_pad = tbt * n_bt

        pad_rows = bt_pad - BT
        pad_cols = self.f_pad - slab.shape[1]
        if pad_rows or pad_cols:
            slab = jnp.pad(slab, ((0, pad_rows), (0, pad_cols)))

        y = _run_bandsplit_fc(slab, self.w_kernel, self.b_kernel,
                              self.starts_kernel, tbt)             # [K, bt_pad, D] bf16

        # NOTE(perf): downstream could consume this [K, B, T, D] bf16 tensor
        # directly; the slice/reshape/transpose/cast below exists only to
        # reproduce the torch module's [B, D, T, K] f32 output exactly.
        y = y[:, :BT, :].reshape(K, B, T, D)
        return jnp.transpose(y, (1, 3, 2, 0)).astype(jnp.float32)  # [B, D, T, K]

    # ---- pure-JAX f32 reference (mimics torch op-for-op) ----------------------

    def reference(self, x: jax.Array) -> jax.Array:
        B, C, F, T = x.shape
        outs = []
        for i, (s, e) in enumerate(self.bandwidth_indices):
            xb = x[:, :, s:e]                                      # [B, C, w, T]
            if jnp.iscomplexobj(xb):
                xb = jnp.stack([jnp.real(xb), jnp.imag(xb)], axis=-1)  # view_as_real
                xb = jnp.transpose(xb, (0, 1, 4, 2, 3))            # [B, C, 2, w, T]
            xb = xb.reshape(B, -1, T)
            xb = jnp.swapaxes(xb, -1, -2).astype(jnp.float32)      # [B, T, in_i]
            outs.append(xb @ self.w_torch[i].T + self.b_torch[i])  # [B, T, D]
        stacked = jnp.stack(outs, axis=3)                          # [B, T, D, K]
        return jnp.transpose(stacked, (0, 2, 1, 3))                # [B, D, T, K]


# ------------------------------------------------------------------- main ----

if __name__ == "__main__":
    # Small config: sr=8000, n_fft=64 -> 33 freq bins; bandsplits yield 6 bands
    # of widths (4,4,8,8,8,1) bins -> feature dims (16,16,32,32,32,4), all served
    # by one IN_WIN=128 window. fc_dim=128 keeps kernel stores lane-dense.
    sr, n_fft = 8000, 64
    bandsplits = [(1000, 500), (4000, 1000)]
    B, C, T = 2, 2, 16
    F = n_fft // 2 + 1
    fc_dim = 128

    key = jax.random.PRNGKey(0)
    k_mod, k_re, k_im = jax.random.split(key, 3)

    module = BandSplitModulePallas(
        sr=sr,
        n_fft=n_fft,
        bandsplits=bandsplits,
        t_timesteps=T,
        fc_dim=fc_dim,
        complex_as_channel=True,
        is_mono=False,
        is_layernorm=False,
        key=k_mod,
    )

    x_re = jax.random.normal(k_re, (B, C, F, T), dtype=jnp.float32)
    x_im = jax.random.normal(k_im, (B, C, F, T), dtype=jnp.float32)
    x = (x_re + 1j * x_im).astype(jnp.complex64)

    fwd = jax.jit(module.__call__)
    out = jax.block_until_ready(fwd(x))

    K = len(module.bandwidth_indices)
    assert out.shape == (B, fc_dim, T, K), out.shape

    ref = np.asarray(jax.block_until_ready(module.reference(x)))
    # bf16 activations/weights/output with f32 MXU accumulation vs f32 reference.
    err = float(np.max(np.abs(np.asarray(out) - ref)))
    assert np.allclose(np.asarray(out), ref, rtol=3e-2, atol=3e-2), err

    print("KERNEL_OK")
</pallas_src>

<mosaic_0001>
module attributes {stable_mosaic.version = 11 : i64} {
  func.func @_bandsplit_fc_kernel(%arg0: i32, %arg1: i32, %arg2: memref<6xi32, #tpu.memory_space<smem>>, %arg3: memref<32x256xbf16, #tpu.memory_space<any>>, %arg4: memref<1x128x128xbf16, #tpu.memory_space<vmem>>, %arg5: memref<1x1x128xf32, #tpu.memory_space<vmem>>, %arg6: memref<1x32x128xbf16, #tpu.memory_space<vmem>>, %arg7: memref<32x128xbf16, #tpu.memory_space<vmem>>, %arg8: memref<1x!tpu.dma_semaphore, #tpu.memory_space<semaphore_mem>>) attributes {dimension_semantics = [#tpu.dimension_semantics<parallel>, #tpu.dimension_semantics<parallel>], iteration_bounds = array<i64: 6, 1>, scalar_prefetch = 1 : i64, scratch_operands = 2 : i64, tpu.core_type = #tpu.core_type<tc>, window_params = [{}, {transform_indices = @transform_1, window_bounds = array<i64: 1, 128, 128>}, {transform_indices = @transform_2, window_bounds = array<i64: 1, 1, 128>}, {transform_indices = @transform_3, window_bounds = array<i64: 1, 32, 128>}]} {
    %0 = arith.index_cast %arg0 : i32 to index
    %1 = memref.load %arg2[%0] : memref<6xi32, #tpu.memory_space<smem>>
    %2 = tpu.assume_multiple %1, 128 : i32
    %c32_i32 = arith.constant 32 : i32
    %3 = arith.muli %arg1, %c32_i32 : i32
    %4 = tpu.assume_multiple %3, 8 : i32
    %c0_i32 = arith.constant 0 : i32
    %5 = tpu.memref_slice %arg3[%4, %2] : memref<32x256xbf16, #tpu.memory_space<any>> -> memref<32x128xbf16, #tpu.memory_space<any>>
    %6 = tpu.memref_slice %arg8[%c0_i32] : memref<1x!tpu.dma_semaphore, #tpu.memory_space<semaphore_mem>> -> memref<1x!tpu.dma_semaphore, #tpu.memory_space<semaphore_mem>>
    %7 = tpu.memref_squeeze %6 : memref<1x!tpu.dma_semaphore, #tpu.memory_space<semaphore_mem>> -> memref<!tpu.dma_semaphore, #tpu.memory_space<semaphore_mem>>
    tpu.enqueue_dma source(%5 : memref<32x128xbf16, #tpu.memory_space<any>>) target(%arg7 : memref<32x128xbf16, #tpu.memory_space<vmem>>) target_semaphore(%7 : memref<!tpu.dma_semaphore, #tpu.memory_space<semaphore_mem>>)
    %c0_i32_0 = arith.constant 0 : i32
    %8 = tpu.memref_slice %arg3[%4, %2] : memref<32x256xbf16, #tpu.memory_space<any>> -> memref<32x128xbf16, #tpu.memory_space<any>>
    %9 = tpu.memref_slice %arg8[%c0_i32_0] : memref<1x!tpu.dma_semaphore, #tpu.memory_space<semaphore_mem>> -> memref<1x!tpu.dma_semaphore, #tpu.memory_space<semaphore_mem>>
    %10 = tpu.memref_squeeze %9 : memref<1x!tpu.dma_semaphore, #tpu.memory_space<semaphore_mem>> -> memref<!tpu.dma_semaphore, #tpu.memory_space<semaphore_mem>>
    tpu.wait_dma2 semaphore(%10 : memref<!tpu.dma_semaphore, #tpu.memory_space<semaphore_mem>>) src(%8 : memref<32x128xbf16, #tpu.memory_space<any>>) dst(%arg7 : memref<32x128xbf16, #tpu.memory_space<vmem>>)
    %c0 = arith.constant 0 : index
    %c0_1 = arith.constant 0 : index
    %11 = vector.load %arg7[%c0, %c0_1] : memref<32x128xbf16, #tpu.memory_space<vmem>>, vector<32x128xbf16>
    %c0_2 = arith.constant 0 : index
    %c0_3 = arith.constant 0 : index
    %c0_4 = arith.constant 0 : index
    %12 = vector.load %arg4[%c0_2, %c0_3, %c0_4] : memref<1x128x128xbf16, #tpu.memory_space<vmem>>, vector<1x128x128xbf16>
    %13 = vector.shape_cast %12 : vector<1x128x128xbf16> to vector<128x128xbf16>
    %cst = arith.constant dense<0.000000e+00> : vector<32x128xf32>
    %14 = tpu.matmul %11, %13, %cst {dimension_numbers = #tpu.dot_dimension_numbers<[1], [0], [0], [1], [0, 0, 1, 1], [], []>} : vector<32x128xbf16>, vector<128x128xbf16>, vector<32x128xf32> -> vector<32x128xf32>
    %c0_5 = arith.constant 0 : index
    %c0_6 = arith.constant 0 : index
    %c0_7 = arith.constant 0 : index
    %15 = vector.load %arg5[%c0_5, %c0_6, %c0_7] : memref<1x1x128xf32, #tpu.memory_space<vmem>>, vector<1x1x128xf32>
    %16 = vector.shape_cast %15 : vector<1x1x128xf32> to vector<1x128xf32>
    %17 = vector.broadcast %16 : vector<1x128xf32> to vector<32x128xf32>
    %18 = arith.addf %14, %17 : vector<32x128xf32>
    %19 = arith.truncf %18 : vector<32x128xf32> to vector<32x128xbf16>
    %c0_8 = arith.constant 0 : index
    %c0_9 = arith.constant 0 : index
    %c0_10 = arith.constant 0 : index
    %20 = vector.load %arg6[%c0_8, %c0_9, %c0_10] : memref<1x32x128xbf16, #tpu.memory_space<vmem>>, vector<1x32x128xbf16>
    %21 = vector.shape_cast %20 : vector<1x32x128xbf16> to vector<32x128xbf16>
    %22 = vector.shape_cast %19 : vector<32x128xbf16> to vector<1x32x128xbf16>
    tpu.vector_store %arg6[%c0_8, %c0_9, %c0_10], %22 {strides = array<i32>} : memref<1x32x128xbf16, #tpu.memory_space<vmem>>, vector<1x32x128xbf16>,
    return
  }
  func.func @transform_1(%arg0: i32, %arg1: i32, %arg2: memref<6xi32, #tpu.memory_space<smem>>) -> (i32, i32, i32) {
    %c0_i32 = arith.constant 0 : i32
    %c0_i32_0 = arith.constant 0 : i32
    %c0_i32_1 = arith.constant 0 : i32
    return %arg0, %c0_i32, %c0_i32_0 : i32, i32, i32
  }
  func.func @transform_2(%arg0: i32, %arg1: i32, %arg2: memref<6xi32, #tpu.memory_space<smem>>) -> (i32, i32, i32) {
    %c0_i32 = arith.constant 0 : i32
    %c0_i32_0 = arith.constant 0 : i32
    %c0_i32_1 = arith.constant 0 : i32
    return %arg0, %c0_i32, %c0_i32_0 : i32, i32, i32
  }
  func.func @transform_3(%arg0: i32, %arg1: i32, %arg2: memref<6xi32, #tpu.memory_space<smem>>) -> (i32, i32, i32) {
    %c0_i32 = arith.constant 0 : i32
    %c0_i32_0 = arith.constant 0 : i32
    return %arg0, %arg1, %c0_i32 : i32, i32, i32
  }
}

</mosaic_0001>

<bundles_post_ra>
// kernel: custom-call.1
= control target key start
LH: loop header
LB: loop body
LE: loop exit
PB: predicated region body
PF: predicated region fallthrough
CT: control target
= control target key end

     0   :  { %s59_s0 = inlined_call_operand.hbm [shape: c64[2,2,33,16], index: 0, kind: input, shape index: {}]   ;;  %s60_s1 = inlined_call_operand.vmem [shape: f32[2,2,33,16], index: 1, kind: output, shape index: {}]  }
   0x1   :  { %s2_s8 = scalar_lea.hbm %s59_s0, 1024 }
   0x2   :  { %3 = vsyncpa [#allocation0], 0  ;;  %s4_s11 = sshll.u32 %s60_s1, 4  ;;  %s34_s14 = scalar_lea.hbm %s59_s0, 2048  ;;  %s5_s11 = int_to_ptr.vmem [resolvable:$true] %s4_s11 }
   0x3   :  { %p11_p0 = scmp.ne.s32.totalorder %s2_s8, %s34_s14  ;;  %p13_p1 = scmp.lt.u32.totalorder %s2_s8, %s59_s0 }
   0x4   :  { %p14_p2 = scmp.lt.u32.totalorder %s34_s14, %s34_s14  ;;  %p16_p4 = scmp.lt.u32.totalorder %s34_s14, %s2_s8 }
   0x6   :  { %p15_p3 = por %p14_p2, %p13_p1 }
   0x8   :  { %p17_p5 = por %p16_p4, %p15_p3 }
   0xa   :  { %p18_p6 = pnand %p17_p5, %p11_p0 }
   0xc   :  { %21 = shalt.err (!%p18_p6)  }
   0xd   :  { %s22_s17 = scalar_lea.vmem %s5_s11, 1024  ;;  %p27_p8 = scmp.lt.s32.totalorder %s5_s11, %s5_s11 }
   0xe   :  { %p23_p7 = scmp.ne.s32.totalorder %s5_s11, %s22_s17  ;;  %p28_p9 = scmp.lt.s32.totalorder %s22_s17, %s22_s17 }
  0x10   :  { %p29_p10 = por %p28_p9, %p27_p8 }
  0x12   :  { %p30_p11 = pnand %p29_p10, %p23_p7 }
  0x14   :  { %33 = shalt.err (!%p30_p11)  }
  0x15   :  { %7 = dma.hbm_to_vmem [thread:$0]  %s2_s8, 1024, %s5_s11, [#allocation0] }
  0x16   :  { %35 = dma.done.wait [#allocation0], 1024  }
  0x17   :  { %36 = vsyncadd [#allocation0], 4294966272 }
  0x18   :  { %9 = vsyncpa [#allocation0], 1 }

// kernel: custom-call
= control target key start
LH: loop header
LB: loop body
LE: loop exit
PB: predicated region body
PF: predicated region fallthrough
CT: control target
= control target key end

     0   :  { %2 = vsyncpa [#allocation0], 0  ;;  %s61_s0 = inlined_call_operand.hbm [shape: c64[2,2,33,16], index: 0, kind: input, shape index: {}]   ;;  %s62_s1 = inlined_call_operand.vmem [shape: f32[2,2,33,16], index: 1, kind: output, shape index: {}]  }
   0x1   :  { %s3_s8 = sshll.u32 %s62_s1, 4  ;;  %s9_s11 = scalar_lea.hbm %s61_s0, 1024  ;;  %s4_s8 = int_to_ptr.vmem [resolvable:$true] %s3_s8 }
   0x2   :  { %p10_p0 = scmp.ne.s32.totalorder %s61_s0, %s9_s11  ;;  %s11_s16 = scalar_lea.hbm %s61_s0, 2048 }
   0x3   :  { %p12_p1 = scmp.lt.u32.totalorder %s11_s16, %s9_s11  ;;  %p13_p2 = scmp.lt.u32.totalorder %s9_s11, %s61_s0 }
   0x5   :  { %p14_p3 = por %p13_p2, %p12_p1 }
   0x7   :  { %p15_p4 = pnand %p14_p3, %p10_p0 }
   0x9   :  { %18 = shalt.err (!%p15_p4)  }
   0xa   :  { %s19_s1 = scalar_lea.vmem %s4_s8, 1024  ;;  %p24_p6 = scmp.lt.s32.totalorder %s4_s8, %s4_s8 }
   0xb   :  { %p20_p5 = scmp.ne.s32.totalorder %s4_s8, %s19_s1  ;;  %p25_p7 = scmp.lt.s32.totalorder %s19_s1, %s19_s1 }
   0xd   :  { %p26_p8 = por %p25_p7, %p24_p6 }
   0xf   :  { %p27_p9 = pnand %p26_p8, %p20_p5 }
  0x11   :  { %30 = shalt.err (!%p27_p9)  }
  0x12   :  { %6 = dma.hbm_to_vmem [thread:$0]  %s61_s0, 1024, %s4_s8, [#allocation0] }
  0x13   :  { %31 = dma.done.wait [#allocation0], 1024  }
  0x14   :  { %32 = vsyncadd [#allocation0], 4294966272 }
  0x15   :  { %8 = vsyncpa [#allocation0], 1 }

// kernel: a_call__.1
= control target key start
LH: loop header
LB: loop body
LE: loop exit
PB: predicated region body
PF: predicated region fallthrough
CT: control target
= control target key end

     0   :  { %s762_s0 = inlined_call_operand.vmem [shape: s32[6], index: 0, kind: input, shape index: {}]   ;;  %s763_s1 = inlined_call_operand.vmem [shape: bf16[32,256], index: 1, kind: input, shape index: {}]   ;;  %s764_s2 = inlined_call_operand.vmem [shape: bf16[6,128,128], index: 2, kind: input, shape index: {}]   ;;  %s765_s3 = inlined_call_operand.vmem [shape: f32[6,1,128], index: 3, kind: input, shape index: {}]   ;;  %s766_s4 = inlined_call_operand.vmem [shape: bf16[6,32,128], index: 4, kind: output, shape index: {}]  }
   0x1   :  { %s9_s17 = sshll.u32 %s762_s0, 4  ;;  %s10_s17 = int_to_ptr.vmem [resolvable:$true] %s9_s17 }
   0x2   :  { %s630_s18 = scalar_lea.vmem %s10_s17, 16  ;;  %p635_p1 = scmp.lt.s32.totalorder %s10_s17, %s10_s17 }
   0x3   :  { %p631_p0 = scmp.ne.s32.totalorder %s10_s17, %s630_s18  ;;  %p636_p2 = scmp.lt.s32.totalorder %s630_s18, %s630_s18 }
   0x5   :  { %p637_p3 = por %p636_p2, %p635_p1 }
   0x7   :  { %p638_p4 = pnand %p637_p3, %p631_p0 }
   0x9   :  { %641 = shalt.err (!%p638_p4)  }
   0xa   :  { %s670_s19 = smov [#allocation5]  }
   0xb   :  { %12 = dma.vmem_to_smem %s10_s17, 16, %s670_s19, [#allocation4] }
   0xc   :  { %654 = dma.done.wait [#allocation4], 16 }
   0xd   :  { %655 = vsyncadd [#allocation4], 4294967280 }
   0xe   :  { %14 = sfence }
   0xf   :  { %s699_s20 = smov 0   ;;  %s701_s21 = smov 0  }
  0x10   :  { %s703_s22 = smov 0  }
  0x11 LB: > { %s32_s0 = sadd.s32 1, %s664_s21  ;;  %p528_p5 = scmp.ge.s32.totalorder %s668_s22, 1  ;;  %s668_s22 = sphi %s703_s22, %s20_s22   ;;  %s664_s21 = sphi %s701_s21, %s768_s21   ;;  %s660_s20 = sphi %s699_s20, %s767_s20  }
  0x12   : > { %p34_p6 = scmp.ge.s32.totalorder %s32_s0, 6  ;;  %p142_p7 = scmp.lt.s32.totalorder %s668_s22, 7 }
  0x14   : > { %s770_s0 = smov (%p34_p6, %s32_s0), 0  ;;  %p143_p8 = pnand %p528_p5, %p142_p7 }
  0x15   : > { %p171_p9 = scmp.lt.s32.totalorder (!%p143_p8), %s660_s20, 5  ;;  %s190_s23 = sld [smem:[#allocation5 + %s660_s20]] (!%p143_p8) }
  0x16   : > { %146 = sbr.rel (%p143_p8) target bundleno = 289 (0x121), region = 28 }
  0x1b   : > { %s192_s9 = sshra.s32 (!%p143_p8), %s190_s23, 7 }
  0x1c   : > { %s533_s10 = sshll.u32 (!%p143_p8), %s192_s9, 2 }
  0x1d   : > { %s772_s20 = smov (!%p171_p9, %s660_s20), 5  ;;  %s199_s13 = scalar_lea.vmem %s763_s1, %s533_s10 }
  0x1e   : > { %s550_s24 = sshll.u32 %s772_s20, 6  ;;  %s178_s27 = scalar_lea.vmem %s765_s3, %s772_s20  ;;  %v217_v0 = vld [vmem:[%s199_s13] sm:$0xf]  ;;  %v219_v1 = vld [vmem:[%s199_s13 + $0x8] sm:$0xf] }
  0x1f   : > { %s727_s30 = scalar_lea.vmem %s764_s2, %s550_s24  ;;  %s551_s5 = sshll.u32 %s772_s20, 4  ;;  %v221_v2 = vld [vmem:[%s199_s13 + $0x10] sm:$0xf]  ;;  %218 = vst [vmem:[#allocation2] sm:$0xf] %v217_v0 }
  0x20   : > { %s733_s8 = scalar_lea.vmem %s766_s4, %s551_s5  ;;  %220 = vst [vmem:[#allocation2 + $0x4] sm:$0xf] %v219_v1  ;;  %222 = vst [vmem:[#allocation2 + $0x8] sm:$0xf] %v221_v2  ;;  %v223_v3 = vld [vmem:[%s199_s13 + $0x18] sm:$0xf] }
  0x21   : > { %224 = vst [vmem:[#allocation2 + $0xc] sm:$0xf] %v223_v3 }
  0x22   : > { %263 = vsyncadd [#allocation3], 256 }
  0x23   : > { %656 = dma.done.wait [#allocation3], 256 }
  0x24   : > { %657 = vsyncadd [#allocation3], 4294967040  ;;  %v622_v4 = vld [vmem:[%s727_s30] sm:$0xff]   ;;  %v623_v5 = vld [vmem:[%s727_s30 + $0x8] sm:$0xff]  }
  0x25   : > { %577 = vmatprep.subr.bf16.mxu0 %v622_v4  ;;  %v624_v6 = vld [vmem:[%s727_s30 + $0x10] sm:$0xff]   ;;  %v625_v7 = vld [vmem:[%s727_s30 + $0x18] sm:$0xff]   ;;  %v626_v9 = vld [vmem:[%s727_s30 + $0x20] sm:$0xff]  }
  0x26   : > { %578 = vmatpush3.bf16.msra.mxu0 %v622_v4  ;;  %v627_v10 = vld [vmem:[%s727_s30 + $0x28] sm:$0xff]   ;;  %v628_v11 = vld [vmem:[%s727_s30 + $0x30] sm:$0xff]   ;;  %v629_v12 = vld [vmem:[%s727_s30 + $0x38] sm:$0xff]  }
  0x27   : > { %579 = vmatprep.subr.bf16.mxu0 %v623_v5  ;;  %v268_v8 = vld [vmem:[#allocation2] sm:$0xff] }
  0x28   : > { %593 = vmatprep.mubr.bf16.mxu0 %v268_v8  ;;  %v269_v13 = vld [vmem:[#allocation2 + $0x8] sm:$0xff]  ;;  %v534_v15 = vld [vmem:[%s178_s27] ss:$0 sm:$0xff] }
  0x2a   : > { %580 = vmatpush3.bf16.msra.mxu0 %v623_v5 }
  0x2b   : > { %581 = vmatprep.subr.bf16.mxu0 %v624_v6 }
  0x2e   : > { %582 = vmatpush3.bf16.msra.mxu0 %v624_v6 }
  0x2f   : > { %583 = vmatprep.subr.bf16.mxu0 %v625_v7 }
  0x32   : > { %584 = vmatpush3.bf16.msra.mxu0 %v625_v7 }
  0x33   : > { %585 = vmatprep.subr.bf16.mxu0 %v626_v9 }
  0x36   : > { %586 = vmatpush3.bf16.msra.mxu0 %v626_v9 }
  0x37   : > { %587 = vmatprep.subr.bf16.mxu0 %v627_v10 }
  0x3a   : > { %588 = vmatpush3.bf16.msra.mxu0 %v627_v10 }
  0x3b   : > { %589 = vmatprep.subr.bf16.mxu0 %v628_v11 }
  0x3e   : > { %590 = vmatpush3.bf16.msra.mxu0 %v628_v11 }
  0x3f   : > { %591 = vmatprep.subr.bf16.mxu0 %v629_v12 }
  0x42   : > { %592 = vmatpush3.bf16.msra.mxu0 %v629_v12 }
  0x45   : > { %594 = vmatmul.mubr.bf16.vlgmr.msra.gmra.mrb[0].mxu0 %v269_v13 }
 0x118   : > { %v595_v14 = vpop.f32.mrb[0].mxu0 }
 0x119   : > { %v375_v16 = vpop.f32.mrb[1].mxu0  ;;  %v384_v18 = vadd.f32 %v595_v14, %v534_v15 }
 0x11a   : > { %v596_v17 = vpop.f32.mrb[2].mxu0  ;;  %v376_v21 = vadd.f32 %v534_v15, %v375_v16 }
 0x11b   : > { %v387_v19 = vadd.f32 %v596_v17, %v534_v15  ;;  %v378_v20 = vpop.f32.mrb[3].mxu0 }
 0x11c   : > { %v379_v22 = vadd.f32 %v534_v15, %v378_v20 }
 0x11d   : > { %v564_v23 = vpack.c.bf16 %v387_v19, %v384_v18 }
 0x11e   : > { %v559_v24 = vpack.c.bf16 %v379_v22, %v376_v21 }
 0x11f   : > { %566 = vst [vmem:[%s733_s8 + $0x8] sm:$0xff] %v564_v23  }
 0x120   : > { %560 = vst [vmem:[%s733_s8] sm:$0xff] %v559_v24  }
 0x121 PF: > { %s20_s22 = sadd.s32 1, %s668_s22   ;;  %s767_s20 = smov %s664_s21 }
 0x122   : > { %p17_p10 = scmp.ge.s32.totalorder %s20_s22, 8   ;;  %s768_s21 = smov %s770_s0 }
 0x124   :  { %19 = sbr.rel (!%p17_p10) target bundleno = 17 (0x11), region = 113 }
 0x12b   :  { %440 = vsyncmov [#allocation3] }
 0x12e   :  { %s441_s16 = vpop.sfrf %440 }
 0x12f   :  { %p549_p11 = scmp.ne.s32.totalorder %s441_s16, 0 }
 0x131   :  { %445 = shalt.err (%p549_p11)  }

</bundles_post_ra>
